<compile_context>
chip_gen: v6e
topology: v6e:2x2x1
jax: 0.10.0
libtpu: 0.0.40
codegen_flags: <defaults>
</compile_context>

<pallas_src>
import functools

import jax
import jax.numpy as jnp
from jax import lax
from jax.experimental import pallas as pl
from jax.experimental.pallas import tpu as pltpu

LANE = 128
SUBLANE = 8


def _round_up(x, m):
    return (x + m - 1) // m * m


def _pcc_stats_kernel(p_ref, t_ref, o_ref, *, tm, rows, blocks_per_core,
                      needs_mask):
    """Accumulate 5 sufficient statistics into a (5, 8, 128) partial-sum block
    (one such block per core along grid axis 0)."""
    c = pl.program_id(0)   # core split (parallel)
    i = pl.program_id(1)   # row-block reduction (arbitrary)

    @pl.when(i == 0)
    def _init():
        o_ref[...] = jnp.zeros_like(o_ref)

    def accumulate(pf, tf):
        # Fold the (tm, 128) tile to one (8, 128) vreg per statistic before
        # touching the accumulator: O(1) accumulator traffic per step.
        pr = pf.reshape(tm // SUBLANE, SUBLANE, LANE)
        tr = tf.reshape(tm // SUBLANE, SUBLANE, LANE)
        o_ref[0] += jnp.sum(pr, axis=0)
        o_ref[1] += jnp.sum(tr, axis=0)
        o_ref[2] += jnp.sum(pr * pr, axis=0)
        o_ref[3] += jnp.sum(tr * tr, axis=0)
        o_ref[4] += jnp.sum(pr * tr, axis=0)

    row0 = (c * blocks_per_core + i) * tm  # first logical row of this block

    if needs_mask:
        is_tail = row0 + tm > rows

        @pl.when(is_tail)
        def _tail():
            # Rows at or beyond `rows` hold unspecified data (ragged last
            # block / clamped duplicate block) -> zero them before summing.
            ri = lax.broadcasted_iota(jnp.int32, (tm, LANE), 0)
            valid = (row0 + ri) < rows
            pf = jnp.where(valid, p_ref[...].astype(jnp.float32), 0.0)
            tf = jnp.where(valid, t_ref[...].astype(jnp.float32), 0.0)
            accumulate(pf, tf)

        @pl.when(jnp.logical_not(is_tail))
        def _body():
            accumulate(p_ref[...].astype(jnp.float32),
                       t_ref[...].astype(jnp.float32))
    else:
        accumulate(p_ref[...].astype(jnp.float32),
                   t_ref[...].astype(jnp.float32))


def pcc_loss(y_pred, y_true, *, tm=2048):
    """Pallas-backed Pearson-correlation-coefficient loss.

    Accepts arrays of any (identical) shape and any float dtype; returns a
    float32 scalar `1 - pcc`.
    """
    assert y_pred.shape == y_true.shape
    n = int(y_pred.size)

    p = y_pred.reshape(-1)
    t = y_true.reshape(-1)

    # Sublane packing granularity: f32 -> 8 rows, bf16/f16 -> 16, 8-bit -> 32.
    sub = max(SUBLANE,
              32 // jnp.dtype(p.dtype).itemsize,
              32 // jnp.dtype(t.dtype).itemsize)

    # Minimal zero pad so the flat length is a multiple of sub*128 (zeros do
    # not perturb any accumulated sum). This is a no-op for aligned sizes, so
    # large well-shaped inputs incur no extra HBM copy.
    chunk = sub * LANE
    padded = _round_up(max(n, chunk), chunk)
    if padded != n:
        p = jnp.pad(p, (0, padded - n))
        t = jnp.pad(t, (0, padded - n))
    rows = padded // LANE                      # multiple of `sub`
    p = p.reshape(rows, LANE)
    t = t.reshape(rows, LANE)

    tm_eff = min(_round_up(tm, sub), rows)
    nblk = (rows + tm_eff - 1) // tm_eff

    # Split the row-block range across the (up to) two TensorCores of a v7x
    # chip; on single-core chips the leading axis is a cheap 2-step outer loop.
    ncores = 2 if nblk >= 2 else 1
    bpc = (nblk + ncores - 1) // ncores        # blocks per core
    # Masking is needed iff some logical block sticks out past `rows` (ragged
    # last block and/or an odd block count across the two cores).
    needs_mask = (ncores * bpc * tm_eff) != rows

    def in_map(c, i):
        # Clamp so a fully out-of-range logical block re-reads the last valid
        # block; its contribution is masked to zero inside the kernel.
        return (jnp.minimum(c * bpc + i, nblk - 1), 0)

    kernel = functools.partial(
        _pcc_stats_kernel, tm=tm_eff, rows=rows, blocks_per_core=bpc,
        needs_mask=needs_mask)

    stats = pl.pallas_call(
        kernel,
        out_shape=jax.ShapeDtypeStruct((ncores * 5, SUBLANE, LANE),
                                       jnp.float32),
        grid_spec=pltpu.PrefetchScalarGridSpec(
            num_scalar_prefetch=0,
            grid=(ncores, bpc),
            in_specs=[
                pl.BlockSpec((tm_eff, LANE), in_map),
                pl.BlockSpec((tm_eff, LANE), in_map),
            ],
            out_specs=pl.BlockSpec((5, SUBLANE, LANE), lambda c, i: (c, 0, 0)),
        ),
        compiler_params=pltpu.CompilerParams(
            dimension_semantics=("parallel", "arbitrary")),
    )(p, t)

    # Tiny final combine (10 numbers' worth of work) in plain JAX.
    s = stats.reshape(ncores, 5, SUBLANE * LANE).sum(axis=(0, 2))   # (5,)
    sp, st, sp2, st2, spt = s[0], s[1], s[2], s[3], s[4]
    nf = jnp.float32(n)
    mp = sp / nf
    mt = st / nf
    var_p = (sp2 - sp * mp) / (nf - 1.0)       # unbiased, matches torch.var
    var_t = (st2 - st * mt) / (nf - 1.0)
    cov = spt / nf - mp * mt                   # biased (N), matches torch.mean
    pcc = cov / (jnp.sqrt(var_p) * jnp.sqrt(var_t))
    return (1.0 - pcc).astype(jnp.float32)


def _reference_pcc_loss(y_pred, y_true):
    """Pure-JAX reference mirroring the PyTorch module."""
    yp = y_pred.astype(jnp.float32)
    yt = y_true.astype(jnp.float32)
    mp, mt = jnp.mean(yp), jnp.mean(yt)
    vp = jnp.var(yp, ddof=1)
    vt = jnp.var(yt, ddof=1)
    cov = jnp.mean((yp - mp) * (yt - mt))
    return 1.0 - cov / (jnp.sqrt(vp) * jnp.sqrt(vt))


if __name__ == "__main__":
    key = jax.random.PRNGKey(0)

    def make_pair(k, shape, dtype):
        k1, k2 = jax.random.split(k)
        yp = jax.random.normal(k1, shape, dtype=jnp.float32)
        yt = 0.7 * yp + 0.3 * jax.random.normal(k2, shape, dtype=jnp.float32)
        return yp.astype(dtype), yt.astype(dtype)

    k1, k2, k3, k4 = jax.random.split(key, 4)

    # 1) Basic NCHW feature-map shape, single block, default tile size.
    yp, yt = make_pair(k1, (2, 4, 16, 16), jnp.float32)
    loss = jax.block_until_ready(pcc_loss(yp, yt))
    ref = _reference_pcc_loss(yp, yt)
    assert abs(float(loss) - float(ref)) < 1e-4, (loss, ref)

    # 2) Odd shape: exercises zero padding, the ragged-tail mask and the
    #    clamped duplicate block on the 2-way core split.
    yp, yt = make_pair(k2, (3, 5, 17, 19), jnp.float32)
    loss = jax.block_until_ready(pcc_loss(yp, yt, tm=16))
    ref = _reference_pcc_loss(yp, yt)
    assert abs(float(loss) - float(ref)) < 1e-4, (loss, ref)

    # 3) Multi-block path with the 2-way core split, no masking.
    yp, yt = make_pair(k3, (4, 8, 32, 64), jnp.float32)
    loss = jax.block_until_ready(pcc_loss(yp, yt, tm=128))
    ref = _reference_pcc_loss(yp, yt)
    assert abs(float(loss) - float(ref)) < 1e-4, (loss, ref)

    # 4) Native bf16 inputs (no wrapper upcast; fp32 cast happens in-kernel).
    yp, yt = make_pair(k4, (2, 4, 16, 16), jnp.bfloat16)
    loss = jax.block_until_ready(pcc_loss(yp, yt))
    ref = _reference_pcc_loss(yp, yt)
    assert abs(float(loss) - float(ref)) < 2e-3, (loss, ref)

    print("KERNEL_OK")
</pallas_src>

<mosaic_0001>
module attributes {stable_mosaic.version = 11 : i64} {
  func.func @_pcc_stats_kernel(%arg0: i32, %arg1: i32, %arg2: memref<16x128xf32, #tpu.memory_space<vmem>>, %arg3: memref<16x128xf32, #tpu.memory_space<vmem>>, %arg4: memref<5x8x128xf32, #tpu.memory_space<vmem>>) attributes {dimension_semantics = [#tpu.dimension_semantics<parallel>, #tpu.dimension_semantics<arbitrary>], iteration_bounds = array<i64: 1, 1>, scalar_prefetch = 0 : i64, scratch_operands = 0 : i64, tpu.core_type = #tpu.core_type<tc>, window_params = [{transform_indices = @transform_0, window_bounds = array<i64: 16, 128>}, {transform_indices = @transform_1, window_bounds = array<i64: 16, 128>}, {transform_indices = @transform_2, window_bounds = array<i64: 5, 8, 128>}]} {
    %c0_i32 = arith.constant 0 : i32
    %0 = arith.cmpi eq, %arg1, %c0_i32 : i32
    %1 = arith.extui %0 : i1 to i32
    %c0_i32_0 = arith.constant 0 : i32
    %2 = arith.cmpi ne, %1, %c0_i32_0 : i32
    scf.if %2 {
      %cst_34 = arith.constant 0.000000e+00 : f32
      %45 = vector.broadcast %cst_34 : f32 to vector<5x8x128xf32>
      %c0_35 = arith.constant 0 : index
      %c0_36 = arith.constant 0 : index
      %c0_37 = arith.constant 0 : index
      %46 = vector.load %arg4[%c0_35, %c0_36, %c0_37] : memref<5x8x128xf32, #tpu.memory_space<vmem>>, vector<5x8x128xf32>
      tpu.vector_store %arg4[%c0_35, %c0_36, %c0_37], %45 {strides = array<i32>} : memref<5x8x128xf32, #tpu.memory_space<vmem>>, vector<5x8x128xf32>,
    } else {
    }
    %c0 = arith.constant 0 : index
    %c0_1 = arith.constant 0 : index
    %3 = vector.load %arg2[%c0, %c0_1] : memref<16x128xf32, #tpu.memory_space<vmem>>, vector<16x128xf32>
    %c0_2 = arith.constant 0 : index
    %c0_3 = arith.constant 0 : index
    %4 = vector.load %arg3[%c0_2, %c0_3] : memref<16x128xf32, #tpu.memory_space<vmem>>, vector<16x128xf32>
    %5 = vector.shape_cast %3 : vector<16x128xf32> to vector<2x8x128xf32>
    %6 = vector.shape_cast %4 : vector<16x128xf32> to vector<2x8x128xf32>
    %c0_4 = arith.constant 0 : index
    %c0_5 = arith.constant 0 : index
    %c0_6 = arith.constant 0 : index
    %7 = vector.load %arg4[%c0_4, %c0_5, %c0_6] : memref<5x8x128xf32, #tpu.memory_space<vmem>>, vector<1x8x128xf32>
    %8 = vector.shape_cast %7 : vector<1x8x128xf32> to vector<8x128xf32>
    %cst = arith.constant dense<0.000000e+00> : vector<8x128xf32>
    %9 = vector.multi_reduction <add>, %5, %cst [0] : vector<2x8x128xf32> to vector<8x128xf32>
    %10 = arith.addf %8, %9 : vector<8x128xf32>
    %c0_7 = arith.constant 0 : index
    %c0_8 = arith.constant 0 : index
    %c0_9 = arith.constant 0 : index
    %11 = vector.load %arg4[%c0_7, %c0_8, %c0_9] : memref<5x8x128xf32, #tpu.memory_space<vmem>>, vector<1x8x128xf32>
    %12 = vector.shape_cast %11 : vector<1x8x128xf32> to vector<8x128xf32>
    %13 = vector.shape_cast %10 : vector<8x128xf32> to vector<1x8x128xf32>
    tpu.vector_store %arg4[%c0_7, %c0_8, %c0_9], %13 {strides = array<i32>} : memref<5x8x128xf32, #tpu.memory_space<vmem>>, vector<1x8x128xf32>,
    %c1 = arith.constant 1 : index
    %c0_10 = arith.constant 0 : index
    %c0_11 = arith.constant 0 : index
    %14 = vector.load %arg4[%c1, %c0_10, %c0_11] : memref<5x8x128xf32, #tpu.memory_space<vmem>>, vector<1x8x128xf32>
    %15 = vector.shape_cast %14 : vector<1x8x128xf32> to vector<8x128xf32>
    %cst_12 = arith.constant dense<0.000000e+00> : vector<8x128xf32>
    %16 = vector.multi_reduction <add>, %6, %cst_12 [0] : vector<2x8x128xf32> to vector<8x128xf32>
    %17 = arith.addf %15, %16 : vector<8x128xf32>
    %c1_13 = arith.constant 1 : index
    %c0_14 = arith.constant 0 : index
    %c0_15 = arith.constant 0 : index
    %18 = vector.load %arg4[%c1_13, %c0_14, %c0_15] : memref<5x8x128xf32, #tpu.memory_space<vmem>>, vector<1x8x128xf32>
    %19 = vector.shape_cast %18 : vector<1x8x128xf32> to vector<8x128xf32>
    %20 = vector.shape_cast %17 : vector<8x128xf32> to vector<1x8x128xf32>
    tpu.vector_store %arg4[%c1_13, %c0_14, %c0_15], %20 {strides = array<i32>} : memref<5x8x128xf32, #tpu.memory_space<vmem>>, vector<1x8x128xf32>,
    %c2 = arith.constant 2 : index
    %c0_16 = arith.constant 0 : index
    %c0_17 = arith.constant 0 : index
    %21 = vector.load %arg4[%c2, %c0_16, %c0_17] : memref<5x8x128xf32, #tpu.memory_space<vmem>>, vector<1x8x128xf32>
    %22 = vector.shape_cast %21 : vector<1x8x128xf32> to vector<8x128xf32>
    %23 = arith.mulf %5, %5 : vector<2x8x128xf32>
    %cst_18 = arith.constant dense<0.000000e+00> : vector<8x128xf32>
    %24 = vector.multi_reduction <add>, %23, %cst_18 [0] : vector<2x8x128xf32> to vector<8x128xf32>
    %25 = arith.addf %22, %24 : vector<8x128xf32>
    %c2_19 = arith.constant 2 : index
    %c0_20 = arith.constant 0 : index
    %c0_21 = arith.constant 0 : index
    %26 = vector.load %arg4[%c2_19, %c0_20, %c0_21] : memref<5x8x128xf32, #tpu.memory_space<vmem>>, vector<1x8x128xf32>
    %27 = vector.shape_cast %26 : vector<1x8x128xf32> to vector<8x128xf32>
    %28 = vector.shape_cast %25 : vector<8x128xf32> to vector<1x8x128xf32>
    tpu.vector_store %arg4[%c2_19, %c0_20, %c0_21], %28 {strides = array<i32>} : memref<5x8x128xf32, #tpu.memory_space<vmem>>, vector<1x8x128xf32>,
    %c3 = arith.constant 3 : index
    %c0_22 = arith.constant 0 : index
    %c0_23 = arith.constant 0 : index
    %29 = vector.load %arg4[%c3, %c0_22, %c0_23] : memref<5x8x128xf32, #tpu.memory_space<vmem>>, vector<1x8x128xf32>
    %30 = vector.shape_cast %29 : vector<1x8x128xf32> to vector<8x128xf32>
    %31 = arith.mulf %6, %6 : vector<2x8x128xf32>
    %cst_24 = arith.constant dense<0.000000e+00> : vector<8x128xf32>
    %32 = vector.multi_reduction <add>, %31, %cst_24 [0] : vector<2x8x128xf32> to vector<8x128xf32>
    %33 = arith.addf %30, %32 : vector<8x128xf32>
    %c3_25 = arith.constant 3 : index
    %c0_26 = arith.constant 0 : index
    %c0_27 = arith.constant 0 : index
    %34 = vector.load %arg4[%c3_25, %c0_26, %c0_27] : memref<5x8x128xf32, #tpu.memory_space<vmem>>, vector<1x8x128xf32>
    %35 = vector.shape_cast %34 : vector<1x8x128xf32> to vector<8x128xf32>
    %36 = vector.shape_cast %33 : vector<8x128xf32> to vector<1x8x128xf32>
    tpu.vector_store %arg4[%c3_25, %c0_26, %c0_27], %36 {strides = array<i32>} : memref<5x8x128xf32, #tpu.memory_space<vmem>>, vector<1x8x128xf32>,
    %c4 = arith.constant 4 : index
    %c0_28 = arith.constant 0 : index
    %c0_29 = arith.constant 0 : index
    %37 = vector.load %arg4[%c4, %c0_28, %c0_29] : memref<5x8x128xf32, #tpu.memory_space<vmem>>, vector<1x8x128xf32>
    %38 = vector.shape_cast %37 : vector<1x8x128xf32> to vector<8x128xf32>
    %39 = arith.mulf %5, %6 : vector<2x8x128xf32>
    %cst_30 = arith.constant dense<0.000000e+00> : vector<8x128xf32>
    %40 = vector.multi_reduction <add>, %39, %cst_30 [0] : vector<2x8x128xf32> to vector<8x128xf32>
    %41 = arith.addf %38, %40 : vector<8x128xf32>
    %c4_31 = arith.constant 4 : index
    %c0_32 = arith.constant 0 : index
    %c0_33 = arith.constant 0 : index
    %42 = vector.load %arg4[%c4_31, %c0_32, %c0_33] : memref<5x8x128xf32, #tpu.memory_space<vmem>>, vector<1x8x128xf32>
    %43 = vector.shape_cast %42 : vector<1x8x128xf32> to vector<8x128xf32>
    %44 = vector.shape_cast %41 : vector<8x128xf32> to vector<1x8x128xf32>
    tpu.vector_store %arg4[%c4_31, %c0_32, %c0_33], %44 {strides = array<i32>} : memref<5x8x128xf32, #tpu.memory_space<vmem>>, vector<1x8x128xf32>,
    return
  }
  func.func @transform_0(%arg0: i32, %arg1: i32) -> (i32, i32) {
    %c1_i32 = arith.constant 1 : i32
    %0 = arith.muli %arg0, %c1_i32 : i32
    %1 = arith.addi %0, %arg1 : i32
    %c0_i32 = arith.constant 0 : i32
    %2 = arith.minsi %1, %c0_i32 : i32
    %c0_i32_0 = arith.constant 0 : i32
    %c0_i32_1 = arith.constant 0 : i32
    return %2, %c0_i32_0 : i32, i32
  }
  func.func @transform_1(%arg0: i32, %arg1: i32) -> (i32, i32) {
    %c1_i32 = arith.constant 1 : i32
    %0 = arith.muli %arg0, %c1_i32 : i32
    %1 = arith.addi %0, %arg1 : i32
    %c0_i32 = arith.constant 0 : i32
    %2 = arith.minsi %1, %c0_i32 : i32
    %c0_i32_0 = arith.constant 0 : i32
    %c0_i32_1 = arith.constant 0 : i32
    return %2, %c0_i32_0 : i32, i32
  }
  func.func @transform_2(%arg0: i32, %arg1: i32) -> (i32, i32, i32) {
    %c0_i32 = arith.constant 0 : i32
    %c0_i32_0 = arith.constant 0 : i32
    %c0_i32_1 = arith.constant 0 : i32
    return %arg0, %c0_i32, %c0_i32_0 : i32, i32, i32
  }
}

</mosaic_0001>

<bundles_post_ra>
// kernel: tpu_custom_call.1
= control target key start
LH: loop header
LB: loop body
LE: loop exit
PB: predicated region body
PF: predicated region fallthrough
CT: control target
= control target key end

     0   :  { %7 = vsyncpa [#allocation3], 0  ;;  %s235_s0 = inlined_call_operand.hbm [shape: f32[16,128], index: 0, kind: input, shape index: {}]   ;;  %s236_s1 = inlined_call_operand.hbm [shape: f32[16,128], index: 1, kind: input, shape index: {}]   ;;  %s237_s2 = inlined_call_operand.hbm [shape: f32[5,8,128], index: 2, kind: output, shape index: {}]  }
   0x1   :  { %8 = vsyncpa [#allocation6], 0 }
   0x2   :  { %9 = vsyncpa [#allocation4], 0  ;;  %s197_s9 = smov [#allocation2]  }
   0x3   :  { %s21_s10 = sshll.u32 %s197_s9, 4  ;;  %s22_s10 = int_to_ptr.vmem [resolvable:$true] %s21_s10 }
   0x4   :  { %s139_s11 = scalar_lea.vmem %s22_s10, 256  ;;  %p144_p1 = scmp.lt.s32.totalorder %s22_s10, %s22_s10 }
   0x5   :  { %p140_p0 = scmp.ne.s32.totalorder %s22_s10, %s139_s11  ;;  %p145_p2 = scmp.lt.s32.totalorder %s139_s11, %s139_s11 }
   0x7   :  { %p146_p3 = por %p145_p2, %p144_p1 }
   0x9   :  { %p147_p4 = pnand %p146_p3, %p140_p0 }
   0xb   :  { %150 = shalt.err (!%p147_p4)
}
   0xc   :  { %s198_s12 = smov 128   ;;  %s199_s13 = smov 8  }
   0xd   :  { %27 = dma.hbm_to_vmem [thread:$0]  %s235_s0, 256, %s22_s10, [#allocation3], %s198_s12, %s198_s12, %s199_s13  }
   0xe   :  { %s200_s16 = smov [#allocation5]  }
   0xf   :  { %s39_s17 = sshll.u32 %s200_s16, 4  ;;  %s40_s17 = int_to_ptr.vmem [resolvable:$true] %s39_s17 }
  0x10   :  { %s159_s18 = scalar_lea.vmem %s40_s17, 256  ;;  %p164_p6 = scmp.lt.s32.totalorder %s40_s17, %s40_s17 }
  0x11   :  { %p160_p5 = scmp.ne.s32.totalorder %s40_s17, %s159_s18  ;;  %p165_p7 = scmp.lt.s32.totalorder %s159_s18, %s159_s18 }
  0x13   :  { %p166_p8 = por %p165_p7, %p164_p6 }
  0x15   :  { %p167_p9 = pnand %p166_p8, %p160_p5 }
  0x17   :  { %170 = shalt.err (!%p167_p9)
}
  0x18   :  { %45 = dma.hbm_to_vmem [thread:$0]  %s236_s1, 256, %s40_s17, [#allocation6], %s198_s12, %s198_s12, %s199_s13  }
  0x19   :  { %191 = dma.done.wait [#allocation3], 256  }
  0x1a   :  { %192 = vsyncadd [#allocation3], 4294967040 }
  0x1b   :  { %193 = dma.done.wait [#allocation6], 256  }
  0x1c   :  { %194 = vsyncadd [#allocation6], 4294967040  ;;  %v69_v0 = vld [vmem:[#allocation2] sm:$0xff]  ;;  %v70_v1 = vld [vmem:[#allocation2 + $0x8] sm:$0xff]  ;;  %s201_s0 = smov [#allocation7]  }
  0x1d   :  { %v71_v2 = vld [vmem:[#allocation5] sm:$0xff]  ;;  %v74_v3 = vadd.f32 %v70_v1, %v69_v0  ;;  %v72_v4 = vld [vmem:[#allocation5 + $0x8] sm:$0xff]  ;;  %v84_v5 = vmul.f32 %v69_v0, %v69_v0  ;;  %v85_v6 = vmul.f32 %v70_v1, %v70_v1  ;;  %s108_s21 = sshll.u32 %s201_s0, 4  ;;  %s109_s21 = int_to_ptr.vmem [resolvable:$true] %s108_s21 }
  0x1e   :  { %v91_v7 = vmul.f32 %v71_v2, %v71_v2  ;;  %v79_v8 = vadd.f32 %v72_v4, %v71_v2  ;;  %v92_v9 = vmul.f32 %v72_v4, %v72_v4  ;;  %v98_v10 = vmul.f32 %v71_v2, %v69_v0  ;;  %s171_s1 = scalar_lea.vmem %s109_s21, 640  ;;  %p176_p11 = scmp.lt.s32.totalorder %s109_s21, %s109_s21 }
  0x1f   :  { %v99_v11 = vmul.f32 %v72_v4, %v70_v1  ;;  %v86_v12 = vadd.f32 %v85_v6, %v84_v5  ;;  %76 = vst [vmem:[#allocation7] sm:$0xff] %v74_v3  ;;  %p172_p10 = scmp.ne.s32.totalorder %s109_s21, %s171_s1  ;;  %p177_p12 = scmp.lt.s32.totalorder %s171_s1, %s171_s1 }
  0x20   :  { %v93_v13 = vadd.f32 %v92_v9, %v91_v7  ;;  %81 = vst [vmem:[#allocation7 + $0x8] sm:$0xff] %v79_v8 }
  0x21   :  { %v100_v14 = vadd.f32 %v99_v11, %v98_v10  ;;  %88 = vst [vmem:[#allocation7 + $0x10] sm:$0xff] %v86_v12  ;;  %p178_p13 = por %p177_p12, %p176_p11 }
  0x22   :  { %95 = vst [vmem:[#allocation7 + $0x18] sm:$0xff] %v93_v13 }
  0x23   :  { %102 = vst [vmem:[#allocation7 + $0x20] sm:$0xff] %v100_v14  ;;  %p179_p0 = pnand %p178_p13, %p172_p10 }
  0x25   :  { %182 = shalt.err (!%p179_p0)
}
  0x26   :  { %114 = dma.vmem_to_hbm [thread:$0]  %s109_s21, 640, %s237_s2, [#allocation4], %s198_s12, %s198_s12, %s199_s13  }
  0x27   :  { %195 = dma.done.wait [#allocation4], 640  }
  0x28   :  { %196 = vsyncadd [#allocation4], 4294966656 }
  0x29   :  { %118 = vsyncpa [#allocation3], 1 }
  0x2a   :  { %119 = vsyncpa [#allocation6], 1 }
  0x2b   :  { %120 = vsyncpa [#allocation4], 1 }

</bundles_post_ra>
